<compile_context>
chip_gen: v7x
topology: tpu7x:2x2x1
jax: 0.10.0
libtpu: 0.0.40
codegen_flags: <defaults>
</compile_context>

<pallas_src>
import functools
import math

import jax
import jax.numpy as jnp
from jax.experimental import pallas as pl
from jax.experimental.pallas import tpu as pltpu


# Lane-dense column width for the flattened 2-D slab (multiple of 128).
_COLS = 1024
# Per-block target bytes (per buffer).  v7x gets 4 MiB, others 2 MiB.
_DEFAULT_BLOCK_BYTES = 2 * 1024 * 1024
_V7X_BLOCK_BYTES = 4 * 1024 * 1024
# Explicit scoped-VMEM budget: covers in+out double buffering of 4 MiB blocks
# (16 MiB) plus Mosaic scratch; below physical VMEM on v5e/v6e/v7x.
_VMEM_LIMIT_BYTES = 32 * 1024 * 1024
# Below this many bytes, a fused XLA elementwise op beats a pallas_call.
_MIN_PALLAS_BYTES = 256 * 1024


def _func(x):
    # The user-defined lambda: sin(x) * 2.0 + 0.5, elementwise.
    return jnp.sin(x) * 2.0 + 0.5


def _compute_dtype(dtype):
    """bf16/f16 compute natively (fast on v6e/v7x, still correct on v5e);
    everything else (f32, ints) computes in f32."""
    d = jnp.dtype(dtype)
    if d == jnp.dtype(jnp.bfloat16) or d == jnp.dtype(jnp.float16):
        return d
    return jnp.float32


def _apply_func(x, out_dtype):
    # Shared by the XLA fallback, the ragged tail, and (via the kernel) the
    # Pallas path, so all paths use the same compute dtype.
    # Integer dtypes: the final cast truncates toward zero, same as the
    # non-Pallas path (consistent, if not "rounded" semantics).
    return _func(x.astype(_compute_dtype(x.dtype))).astype(out_dtype)


@functools.lru_cache(maxsize=None)
def _target_block_bytes() -> int:
    # Generation-aware: v7x (64 MiB per-TC VMEM, ~3.2 TB/s HBM) benefits from
    # ~4 MiB blocks; v5e/v6e show diminishing returns past ~2 MiB.
    try:
        info = pltpu.get_tpu_info()
        if info.vmem_capacity_bytes == 64 * 1024 * 1024:
            return _V7X_BLOCK_BYTES
    except Exception:
        pass
    return _DEFAULT_BLOCK_BYTES


def _make_kernel(compute_dtype):
    def _lambda_kernel(x_ref, o_ref):
        x = x_ref[...].astype(compute_dtype)
        o_ref[...] = _func(x).astype(o_ref.dtype)

    return _lambda_kernel


def _lambda_forward_pallas(img: jax.Array, donate: bool) -> jax.Array:
    """Applies the lambda via a tiled Pallas TPU kernel (any shape/dtype)."""
    orig_shape = img.shape
    dtype = img.dtype
    total = math.prod(orig_shape)
    itemsize = jnp.dtype(dtype).itemsize

    flat = img.reshape(-1)
    main_len = (total // _COLS) * _COLS
    if main_len == 0:
        # Less than one lane-dense row: kernel launch would dominate.
        return _apply_func(img, dtype)

    rows = main_len // _COLS
    # Sublane alignment: 8 rows for 32-bit, 16 for 16-bit, 32 for 8-bit dtypes.
    row_align = max(8, 32 // itemsize)

    block_rows = (_target_block_bytes() // (_COLS * itemsize)) // row_align * row_align
    block_rows = max(row_align, block_rows)
    if rows <= row_align:
        # Single block spanning the whole (tiny) slab; block == full array dim
        # is legal even when it is not a multiple of the sublane tile.
        block_rows = rows
    else:
        # Never taller than the slab (keeps the last block a standard partial
        # boundary block that Pallas masks).
        block_rows = min(block_rows, (rows // row_align) * row_align)
        # Keep >= ~8 grid steps for big inputs: DMA/compute overlap and work
        # for both v7x TensorCores.
        if rows >= 8 * row_align:
            per_step = max(row_align, (rows // 8) // row_align * row_align)
            block_rows = min(block_rows, per_step)

    grid = (pl.cdiv(rows, block_rows),)  # ragged last row-block masked by Pallas

    x2d = (flat if main_len == total else flat[:main_len]).reshape(rows, _COLS)

    out2d = pl.pallas_call(
        _make_kernel(_compute_dtype(dtype)),
        out_shape=jax.ShapeDtypeStruct((rows, _COLS), dtype),
        grid=grid,
        in_specs=[pl.BlockSpec((block_rows, _COLS), lambda i: (i, 0))],
        out_specs=pl.BlockSpec((block_rows, _COLS), lambda i: (i, 0)),
        compiler_params=pltpu.CompilerParams(
            # TODO(synk): verify with xprof on v7x that the single "parallel"
            # axis shards across both TensorCores; else use CORE_PARALLEL.
            dimension_semantics=("parallel",),
            vmem_limit_bytes=_VMEM_LIMIT_BYTES,
        ),
        input_output_aliases=({0: 0} if donate else {}),
    )(x2d)

    out = out2d.reshape(-1)
    if main_len != total:
        # Sub-_COLS tail (< 1024 elements): fused XLA, then a single concat
        # (cheaper than the old pad + prefix-slice pair of full-array passes).
        tail = _apply_func(flat[main_len:], dtype)
        out = jnp.concatenate([out, tail])
    return out.reshape(orig_shape)


def lambda_forward(img: jax.Array, *, force_pallas: bool = False,
                   donate_input: bool = False) -> jax.Array:
    """Lambda.forward: apply the (fixed) user lambda to `img`.

    Small inputs skip Pallas (launch + DMA setup would dominate); pass
    `force_pallas=True` to always take the kernel path.  `donate_input=True`
    aliases the output onto the input HBM buffer (only when the caller can
    actually donate it).
    """
    nbytes = math.prod(img.shape) * jnp.dtype(img.dtype).itemsize
    if not force_pallas and nbytes < _MIN_PALLAS_BYTES:
        return _apply_func(img, img.dtype)
    return _lambda_forward_pallas(img, donate_input)


if __name__ == "__main__":
    k0, k1, k2 = jax.random.split(jax.random.PRNGKey(0), 3)

    # 1) Small NCHW image tensor (2*4*16*16 = 2048, divisible by 1024):
    #    explicit kernel path, single full-dim block.
    x = jax.random.normal(k0, (2, 4, 16, 16), dtype=jnp.float32)
    y_ref = _func(x)
    y = lambda_forward(x, force_pallas=True)
    jax.block_until_ready(y)
    assert y.shape == x.shape and y.dtype == x.dtype
    assert jnp.allclose(y, y_ref, atol=1e-5, rtol=1e-5)

    # 2) Default dispatch on the tiny input -> fused-XLA fallback path.
    y2 = lambda_forward(x)
    jax.block_until_ready(y2)
    assert jnp.allclose(y2, y_ref, atol=1e-5, rtol=1e-5)

    # 3) Larger input (2*4*129*128 = 129*1024 elems): multi-step grid with a
    #    ragged last row-block handled by Pallas masking (no wrapper pad/slice).
    xr = jax.random.normal(k1, (2, 4, 129, 128), dtype=jnp.float32)
    yr = lambda_forward(xr)
    jax.block_until_ready(yr)
    assert yr.shape == xr.shape and yr.dtype == xr.dtype
    assert jnp.allclose(yr, _func(xr), atol=1e-5, rtol=1e-5)

    # 4) Non-divisible total (2*4*32*33 = 8448): Pallas main slab + XLA tail.
    xt = jax.random.normal(k2, (2, 4, 32, 33), dtype=jnp.float32)
    yt = lambda_forward(xt, force_pallas=True)
    jax.block_until_ready(yt)
    assert yt.shape == xt.shape and yt.dtype == xt.dtype
    assert jnp.allclose(yt, _func(xt), atol=1e-5, rtol=1e-5)

    print("KERNEL_OK")
</pallas_src>

<mosaic_0001>
module attributes {stable_mosaic.version = 11 : i64} {
  func.func @_lambda_kernel(%arg0: i32, %arg1: memref<2x1024xf32, #tpu.memory_space<vmem>>, %arg2: memref<2x1024xf32, #tpu.memory_space<vmem>>) attributes {dimension_semantics = [#tpu.dimension_semantics<parallel>], iteration_bounds = array<i64: 1>, scalar_prefetch = 0 : i64, scratch_operands = 0 : i64, tpu.core_type = #tpu.core_type<tc>, window_params = [{transform_indices = @transform_0, window_bounds = array<i64: 2, 1024>}, {transform_indices = @transform_1, window_bounds = array<i64: 2, 1024>}]} {
    %c0 = arith.constant 0 : index
    %c0_0 = arith.constant 0 : index
    %0 = vector.load %arg1[%c0, %c0_0] : memref<2x1024xf32, #tpu.memory_space<vmem>>, vector<2x1024xf32>
    %1 = math.sin %0 : vector<2x1024xf32>
    %cst = arith.constant 2.000000e+00 : f32
    %2 = vector.broadcast %cst : f32 to vector<2x1024xf32>
    %3 = arith.mulf %1, %2 : vector<2x1024xf32>
    %cst_1 = arith.constant 5.000000e-01 : f32
    %4 = vector.broadcast %cst_1 : f32 to vector<2x1024xf32>
    %5 = arith.addf %3, %4 : vector<2x1024xf32>
    %c0_2 = arith.constant 0 : index
    %c0_3 = arith.constant 0 : index
    %6 = vector.load %arg2[%c0_2, %c0_3] : memref<2x1024xf32, #tpu.memory_space<vmem>>, vector<2x1024xf32>
    tpu.vector_store %arg2[%c0_2, %c0_3], %5 {strides = array<i32>} : memref<2x1024xf32, #tpu.memory_space<vmem>>, vector<2x1024xf32>,
    return
  }
  func.func @transform_0(%arg0: i32) -> (i32, i32) {
    %c0_i32 = arith.constant 0 : i32
    %c0_i32_0 = arith.constant 0 : i32
    return %arg0, %c0_i32 : i32, i32
  }
  func.func @transform_1(%arg0: i32) -> (i32, i32) {
    %c0_i32 = arith.constant 0 : i32
    %c0_i32_0 = arith.constant 0 : i32
    return %arg0, %c0_i32 : i32, i32
  }
}

</mosaic_0001>

<bundles_post_ra>
// kernel: tpu_custom_call.1
= control target key start
LH: loop header
LB: loop body
LE: loop exit
PB: predicated region body
PF: predicated region fallthrough
CT: control target
= control target key end

     0   :  { %6 = vsyncpa [#allocation3], 0  ;;  %s444_s0 = inlined_call_operand.hbm [shape: f32[2,1024], index: 0, kind: input, shape index: {}]   ;;  %s445_s1 = inlined_call_operand.hbm [shape: f32[2,1024], index: 1, kind: output, shape index: {}]  }
   0x1   :  { %7 = vsyncpa [#allocation4], 0  ;;  %s332_s6 = smov [#allocation2]   ;;  %s284_s10 = scalar_lea.hbm %s444_s0, 256 }
   0x2   :  { %s14_s7 = sshll.u32 %s332_s6, 4  ;;  %p285_p0 = scmp.ne.s32.totalorder %s444_s0, %s284_s10  ;;  %s15_s7 = int_to_ptr.vmem [resolvable:$true] %s14_s7 }
   0x3   :  { %p288_p1 = scmp.lt.u32.totalorder %s284_s10, %s444_s0 }
   0x5   :  { %p290_p2 = pnand %p288_p1, %p285_p0 }
   0x7   :  { %293 = shalt.err (!%p290_p2)
}
   0x8   :  { %s294_s15 = scalar_lea.vmem %s15_s7, 256  ;;  %p299_p4 = scmp.lt.s32.totalorder %s15_s7, %s15_s7 }
   0x9   :  { %p295_p3 = scmp.ne.s32.totalorder %s15_s7, %s294_s15  ;;  %p300_p5 = scmp.lt.s32.totalorder %s294_s15, %s294_s15 }
   0xb   :  { %p301_p6 = por %p300_p5, %p299_p4 }
   0xd   :  { %p302_p7 = pnand %p301_p6, %p295_p3 }
   0xf   :  { %305 = shalt.err (!%p302_p7)
}
  0x10   :  { %17 = dma.hbm_to_vmem [thread:$0]  %s444_s0, 256, %s15_s7, [#allocation3]  }
  0x11   :  { %328 = dma.done.wait [#allocation3], 256  }
  0x12   :  { %329 = vsyncadd [#allocation3], 4294967040  ;;  %v362_v0 = vld [vmem:[#allocation2] sm:$0xff]  ;;  %v364_v1 = vld [vmem:[#allocation2 + $0x8] sm:$0xff]  ;;  %v333_v24 = vmov 683565275  }
  0x13   :  { %v23_v2 = vand.u32 2147483647, %v362_v0  ;;  %v26_v3 = vand.u32 2139095040, %v362_v0  ;;  %v127_v4 = vand.u32 2147483647, %v364_v1  ;;  %v130_v5 = vand.u32 2139095040, %v364_v1 }
  0x14   :  { %v334_v26 = vmov 2475754826   ;;  %v335_v28 = vmov 2131351028   ;;  %v336_v30 = vmov 2102212464  }
  0x15   :  { %v27_v6 = vshrl.u32 %v26_v3, 23  ;;  %v30_v7 = vand.u32 8388607, %v23_v2  ;;  %v131_v8 = vshrl.u32 %v130_v5, 23  ;;  %v134_v9 = vand.u32 8388607, %v127_v4 }
  0x16   :  { %v337_v32 = vmov 920167782   ;;  %v338_v40 = vmov 1326507024   ;;  %vm25_vm14 = vcmp.lt.s32.totalorder %v362_v0, 0  ;;  %s339_s0 = smov [#allocation5]  }
  0x17   :  { %v252_v10 = vadd.s32 4294967169, %v27_v6  ;;  %v256_v11 = vadd.s32 4294967169, %v131_v8  ;;  %v31_v13 = vor.u32 8388608, %v30_v7  ;;  %v135_v14 = vor.u32 8388608, %v134_v9  ;;  %s243_s18 = sshll.u32 %s339_s0, 4  ;;  %s244_s18 = int_to_ptr.vmem [resolvable:$true] %s243_s18 }
  0x18   :  { %vm24_vm15 = vcmp.le.f32.partialorder %v23_v2, 0.7853982  ;;  %s306_s19 = scalar_lea.vmem %s244_s18, 256  ;;  %p311_p9 = scmp.lt.s32.totalorder %s244_s18, %s244_s18 }
  0x19   :  { %v33_v12 = vadd.s32 1, %v252_v10  ;;  %v137_v15 = vadd.s32 1, %v256_v11  ;;  %v374_v20 = vshll.u32 %v31_v13, 8  ;;  %v376_v22 = vshll.u32 %v135_v14, 8  ;;  %p307_p8 = scmp.ne.s32.totalorder %s244_s18, %s306_s19  ;;  %p312_p10 = scmp.lt.s32.totalorder %s306_s19, %s306_s19 }
  0x1b   :  { %vm34_vm0 = vcmp.gt.s32.totalorder %v33_v12, 0  ;;  %vm138_vm1 = vcmp.gt.s32.totalorder %v137_v15, 0  ;;  %p313_p11 = por %p312_p10, %p311_p9 }
  0x1c   :  { %v35_v16 = vsel %vm34_vm0, %v33_v12, 0  ;;  %v139_v19 = vsel %vm138_vm1, %v137_v15, 0  ;;  %vm129_vm0 = vcmp.lt.s32.totalorder %v364_v1, 0  ;;  %vm128_vm1 = vcmp.le.f32.partialorder %v127_v4, 0.7853982 }
  0x1d   :  { %v36_v17 = vshrl.u32 %v35_v16, 5  ;;  %v37_v18 = vand.u32 31, %v35_v16  ;;  %v141_v21 = vand.u32 31, %v139_v19  ;;  %v378_v34 = vshrl.u32 %v139_v19, 5  ;;  %p314_p12 = pnand %p313_p11, %p307_p8 }
  0x1f   :  { %v38_v23 = vsub.s32 32, %v37_v18  ;;  %v40_v25 = vshll.u32 %v333_v24, %v37_v18  ;;  %v43_v27 = vshll.u32 %v334_v26, %v37_v18  ;;  %v46_v29 = vshll.u32 %v335_v28, %v37_v18 }
  0x20   :  { %v49_v31 = vshll.u32 %v336_v30, %v37_v18  ;;  %v52_v33 = vshll.u32 %v337_v32, %v37_v18  ;;  %vm55_vm2 = vcmp.lt.s32.totalorder %v36_v17, 1  ;;  %vm56_vm3 = vcmp.lt.s32.totalorder %v36_v17, 2 }
  0x21   :  { %v39_v35 = vshrl.u32 %v333_v24, %v38_v23  ;;  %v41_v36 = vshrl.u32 %v334_v26, %v38_v23  ;;  %v44_v37 = vshrl.u32 %v335_v28, %v38_v23  ;;  %v47_v38 = vshrl.u32 %v336_v30, %v38_v23 }
  0x22   :  { %v50_v39 = vshrl.u32 %v337_v32, %v38_v23  ;;  %v53_v41 = vshrl.u32 %v338_v40, %v38_v23  ;;  %vm58_vm4 = vcmp.lt.s32.totalorder %v36_v17, 4  ;;  %v142_v45 = vsub.s32 32, %v141_v21 }
  0x23   :  { %v42_v42 = vor.u32 %v41_v36, %v40_v25  ;;  %v45_v43 = vor.u32 %v44_v37, %v43_v27  ;;  %v48_v44 = vor.u32 %v47_v38, %v46_v29  ;;  %vm57_vm5 = vcmp.lt.s32.totalorder %v36_v17, 3 }
  0x24   :  { %v51_v46 = vor.u32 %v50_v39, %v49_v31  ;;  %v54_v47 = vor.u32 %v53_v41, %v52_v33  ;;  %v144_v48 = vshll.u32 %v333_v24, %v141_v21  ;;  %v147_v56 = vshll.u32 %v334_v26, %v141_v21 }
  0x25   :  { %v59_v49 = vsel %vm55_vm2, %v39_v35, %v42_v42  ;;  %v60_v50 = vsel %vm58_vm4, %v48_v44, 2102212464  ;;  %v63_v51 = vsel %vm55_vm2, %v42_v42, %v45_v43  ;;  %v67_v52 = vsel %vm55_vm2, %v45_v43, %v48_v44 }
  0x26   :  { %v61_v53 = vsel %vm57_vm5, %v45_v43, %v60_v50  ;;  %v64_v54 = vsel %vm58_vm4, %v51_v46, 920167782  ;;  %v68_v55 = vsel %vm58_vm4, %v54_v47, 1326507024  ;;  %v143_v59 = vshrl.u32 %v333_v24, %v142_v45 }
  0x27   :  { %v65_v57 = vsel %vm57_vm5, %v48_v44, %v64_v54  ;;  %v69_v58 = vsel %vm57_vm5, %v51_v46, %v68_v55  ;;  %v145_v60 = vshrl.u32 %v334_v26, %v142_v45  ;;  %v62_v61 = vsel %vm56_vm3, %v59_v49, %v61_v53 }
  0x28   :  { %v66_v62 = vsel %vm56_vm3, %v63_v51, %v65_v57  ;;  %v70_v63 = vsel %vm56_vm3, %v67_v52, %v69_v58  ;;  %v148_v3 = vshrl.u32 %v335_v28, %v142_v45  ;;  %v150_v11 = vshll.u32 %v335_v28, %v141_v21 }
  0x29   :  { %v387_v5 = vmul.u32.u64.low %v374_v20, %v70_v63  ;;  %v388_v6 = vmul.u32.u64.high %v374_v20, %v70_v63, %v387_v5  ;;  %v391_v7 = vmul.u32.u64.low %v374_v20, %v66_v62  ;;  %v392_v8 = vmul.u32.u64.high %v374_v20, %v66_v62, %v391_v7 }
  0x2a   :  { %v146_v9 = vor.u32 %v145_v60, %v144_v48  ;;  %v149_v10 = vor.u32 %v148_v3, %v147_v56  ;;  %v151_v12 = vshrl.u32 %v336_v30, %v142_v45  ;;  %v153_v13 = vshll.u32 %v336_v30, %v141_v21 }
  0x2b   :  { %v154_v14 = vshrl.u32 %v337_v32, %v142_v45  ;;  %v156_v15 = vshll.u32 %v337_v32, %v141_v21  ;;  %v157_v16 = vshrl.u32 %v338_v40, %v142_v45  ;;  %v78_v17 = vmul.u32 %v374_v20, %v62_v61 }
  0x2c   :  { %v152_v18 = vor.u32 %v151_v12, %v150_v11  ;;  %vm159_vm6 = vcmp.lt.s32.totalorder %v378_v34, 1  ;;  %vm160_vm7 = vcmp.lt.s32.totalorder %v378_v34, 2  ;;  %vm80_vm8 = vc.u32 %v388_v6, %v391_v7 }
  0x2d   :  { %v81_v19 = vadd.s32 1, %v392_v8  ;;  %v155_v23 = vor.u32 %v154_v14, %v153_v13  ;;  %vm161_vm9 = vcmp.lt.s32.totalorder %v378_v34, 3  ;;  %v158_v24 = vor.u32 %v157_v16, %v156_v15 }
  0x2e   :  { %vm162_vm10 = vcmp.lt.s32.totalorder %v378_v34, 4  ;;  %v163_v25 = vsel %vm159_vm6, %v143_v59, %v146_v9  ;;  %v167_v21 = vsel %vm159_vm6, %v146_v9, %v149_v10  ;;  %v171_v28 = vsel %vm159_vm6, %v149_v10, %v152_v18 }
  0x2f   :  { %v82_v26 = vsel %vm80_vm8, %v81_v19, %v392_v8  ;;  %v164_v20 = vsel %vm162_vm10, %v152_v18, 2102212464  ;;  %v168_v27 = vsel %vm162_vm10, %v155_v23, 920167782  ;;  %v172_v32 = vsel %vm162_vm10, %v158_v24, 1326507024 }
  0x30   :  { %v83_v29 = vadd.s32 %v82_v26, %v78_v17  ;;  %v165_v30 = vsel %vm161_vm9, %v149_v10, %v164_v20  ;;  %v169_v31 = vsel %vm161_vm9, %v152_v18, %v168_v27  ;;  %v173_v36 = vsel %vm161_vm9, %v155_v23, %v172_v32 }
  0x31   :  { %v166_v33 = vsel %vm160_vm7, %v163_v25, %v165_v30  ;;  %v170_v35 = vsel %vm160_vm7, %v167_v21, %v169_v31  ;;  %v174_v38 = vsel %vm160_vm7, %v171_v28, %v173_v36  ;;  %v79_v57 = vadd.s32 %v391_v7, %v388_v6 }
  0x32   :  { %v84_v37 = vadd.s32 536870912, %v83_v29  ;;  %v409_v39 = vmul.u32.u64.low %v376_v22, %v170_v35  ;;  %v410_v40 = vmul.u32.u64.high %v376_v22, %v170_v35, %v409_v39  ;;  %v182_v44 = vmul.u32 %v376_v22, %v166_v33 }
  0x33   :  { %v413_v41 = vmul.u32.u64.low %v376_v22, %v174_v38  ;;  %v414_v42 = vmul.u32.u64.high %v376_v22, %v174_v38, %v413_v41  ;;  %vm115_vm5 = vweird.f32 %v362_v0  ;;  %vm219_vm9 = vweird.f32 %v364_v1 }
  0x34   :  { %v85_v43 = vshrl.u32 %v84_v37, 30  ;;  %v185_v46 = vadd.s32 1, %v410_v40 }
  0x35   :  { %vm184_vm11 = vc.u32 %v414_v42, %v409_v39  ;;  %v183_v13 = vadd.s32 %v409_v39, %v414_v42 }
  0x36   :  { %v86_v45 = vshll.u32 %v85_v43, 30  ;;  %v186_v34 = vsel %vm184_vm11, %v185_v46, %v410_v40  ;;  %v109_v6 = vsub.s32 4, %v85_v43 }
  0x37   :  { %v187_v48 = vadd.s32 %v186_v34, %v182_v44 }
  0x38   :  { %v87_v47 = vsub.s32 %v83_v29, %v86_v45  ;;  %v110_v25 = vsel %vm25_vm14, %v109_v6, %v85_v43 }
  0x39   :  { %v188_v50 = vadd.s32 536870912, %v187_v48  ;;  %v112_v28 = vsel %vm24_vm15, 0, %v110_v25 }
  0x3a   :  { %v89_v49 = vsub.s32 0, %v87_v47  ;;  %v116_v33 = vadd.s32 3, %v112_v28 }
  0x3b   :  { %v189_v52 = vshrl.u32 %v188_v50, 30 }
  0x3c   :  { %v253_v51 = vmin.u32 %v89_v49, %v87_v47  ;;  %v117_v37 = vand.u32 3, %v116_v33 }
  0x3d   :  { %v190_v54 = vshll.u32 %v189_v52, 30  ;;  %v213_v32 = vsub.s32 4, %v189_v52 }
  0x3e   :  { %v91_v53 = vclz %v253_v51  ;;  %vm122_vm2 = vcmp.eq.s32.totalorder %v117_v37, 2  ;;  %vm119_vm3 = vcmp.eq.s32.totalorder %v117_v37, 0  ;;  %vm118_vm4 = vcmp.lt.s32.totalorder %v117_v37, 2 }
  0x3f   :  { %v191_v56 = vsub.s32 %v187_v48, %v190_v54  ;;  %v214_v36 = vsel %vm129_vm0, %v213_v32, %v189_v52 }
  0x40   :  { %v254_v55 = vadd.s32 4294967294, %v91_v53  ;;  %v216_v40 = vsel %vm128_vm1, 0, %v214_v36 }
  0x41   :  { %v193_v58 = vsub.s32 0, %v191_v56  ;;  %v220_v44 = vadd.s32 3, %v216_v40 }
  0x42   :  { %vm255_vm12 = vcmp.lt.s32.totalorder %v254_v55, 0 }
  0x43   :  { %v94_v22 = vsel %vm255_vm12, 0, %v254_v55  ;;  %v257_v62 = vmin.u32 %v193_v58, %v191_v56  ;;  %v221_v34 = vand.u32 3, %v220_v44 }
  0x44   :  { %v95_v59 = vsub.s32 32, %v94_v22  ;;  %v96_v60 = vshll.u32 %v87_v47, %v94_v22  ;;  %v99_v61 = vsub.s32 4294967266, %v94_v22 }
  0x45   :  { %v195_v5 = vclz %v257_v62  ;;  %vm226_vm6 = vcmp.eq.s32.totalorder %v221_v34, 2  ;;  %vm223_vm7 = vcmp.eq.s32.totalorder %v221_v34, 0  ;;  %vm222_vm8 = vcmp.lt.s32.totalorder %v221_v34, 2 }
  0x46   :  { %v97_v63 = vshrl.u32 %v79_v57, %v95_v59  ;;  %v100_v3 = vadd.s32 127, %v99_v61 }
  0x47   :  { %v258_v10 = vadd.s32 4294967294, %v195_v5 }
  0x48   :  { %v98_v8 = vor.u32 %v97_v63, %v96_v60  ;;  %v101_v9 = vshll.u32 %v100_v3, 23 }
  0x49   :  { %vm259_vm13 = vcmp.lt.s32.totalorder %v258_v10, 0 }
  0x4a   :  { %v102_v11 = vor.u32 4788187, %v101_v9  ;;  %v105_v12 = vcvt.s32.f32 %v98_v8  ;;  %v198_v7 = vsel %vm259_vm13, 0, %v258_v10 }
  0x4b   :  { %v199_v15 = vsub.s32 32, %v198_v7  ;;  %v200_v16 = vshll.u32 %v191_v56, %v198_v7  ;;  %v203_v17 = vsub.s32 4294967266, %v198_v7 }
  0x4c   :  { %v103_v14 = vand.u32 2147483647, %v102_v11 }
  0x4d   :  { %v201_v19 = vshrl.u32 %v183_v13, %v199_v15  ;;  %v204_v23 = vadd.s32 127, %v203_v17 }
  0x4e   :  { %v106_v18 = vmul.f32 %v105_v12, %v103_v14 }
  0x4f   :  { %v202_v21 = vor.u32 %v201_v19, %v200_v16  ;;  %v205_v26 = vshll.u32 %v204_v23, 23 }
  0x50   :  { %v107_v24 = vxor.u32 2147483648, %v106_v18 }
  0x51   :  { %v206_v29 = vor.u32 4788187, %v205_v26  ;;  %v209_v30 = vcvt.s32.f32 %v202_v21 }
  0x52   :  { %v108_v20 = vsel %vm25_vm14, %v107_v24, %v106_v18 }
  0x53   :  { %v111_v27 = vsel %vm24_vm15, %v362_v0, %v108_v20  ;;  %v207_v31 = vand.u32 2147483647, %v206_v29 }
  0x54   :  { %276 = vcosq.f32 %v111_v27 }
  0x55   :  { %278 = vsinq.f32 %v111_v27  ;;  %v210_v35 = vmul.f32 %v209_v30, %v207_v31 }
  0x57   :  { %v211_v2 = vxor.u32 2147483648, %v210_v35 }
  0x59   :  { %v212_v38 = vsel %vm129_vm0, %v211_v2, %v210_v35 }
  0x5a   :  { %v215_v39 = vsel %vm128_vm1, %v364_v1, %v212_v38 }
  0x5b   :  { %280 = vcosq.f32 %v215_v39 }
  0x5c   :  { %282 = vsinq.f32 %v215_v39 }
  0x5e   :  { %v277_v41 = vpop.eup %276 }
  0x5f   :  { %v279_v42 = vpop.eup %278  ;;  %v123_v43 = vxor.u32 2147483648, %v277_v41 }
  0x60   :  { %v120_v45 = vxor.u32 2147483648, %v279_v42 }
  0x61   :  { %v124_v4 = vsel %vm122_vm2, %v123_v43, %v279_v42 }
  0x62   :  { %v121_v46 = vsel %vm119_vm3, %v277_v41, %v120_v45 }
  0x63   :  { %v125_v47 = vsel %vm118_vm4, %v121_v46, %v124_v4 }
  0x64   :  { %v126_v48 = vsel %vm115_vm5, nan, %v125_v47 }
  0x65   :  { %v231_v49 = vmul.f32 2.0, %v126_v48  ;;  %v281_v50 = vpop.eup %280 }
  0x66   :  { %v283_v52 = vpop.eup %282  ;;  %v227_v53 = vxor.u32 2147483648, %v281_v50 }
  0x67   :  { %v233_v51 = vadd.f32 0.5, %v231_v49  ;;  %v224_v54 = vxor.u32 2147483648, %v283_v52 }
  0x68   :  { %v228_v55 = vsel %vm226_vm6, %v227_v53, %v283_v52 }
  0x69   :  { %235 = vst [vmem:[#allocation5] sm:$0xff] %v233_v51  ;;  %v225_v56 = vsel %vm223_vm7, %v281_v50, %v224_v54 }
  0x6a   :  { %v229_v0 = vsel %vm222_vm8, %v225_v56, %v228_v55 }
  0x6b   :  { %v230_v57 = vsel %vm219_vm9, nan, %v229_v0 }
  0x6c   :  { %v232_v22 = vmul.f32 2.0, %v230_v57 }
  0x6e   :  { %v234_v58 = vadd.f32 0.5, %v232_v22 }
  0x70   :  { %236 = vst [vmem:[#allocation5 + $0x8] sm:$0xff] %v234_v58 }
  0x71   :  { %317 = shalt.err (!%p314_p12)
}
  0x72   :  { %s318_s22 = scalar_lea.hbm %s445_s1, 256 }
  0x73   :  { %p319_p13 = scmp.ne.s32.totalorder %s445_s1, %s318_s22  ;;  %p322_p0 = scmp.lt.u32.totalorder %s318_s22, %s445_s1 }
  0x75   :  { %p324_p1 = pnand %p322_p0, %p319_p13 }
  0x77   :  { %327 = shalt.err (!%p324_p1)
}
  0x78   :  { %246 = dma.vmem_to_hbm [thread:$0]  %s244_s18, 256, %s445_s1, [#allocation4]  }
  0x79   :  { %330 = dma.done.wait [#allocation4], 256  }
  0x7a   :  { %331 = vsyncadd [#allocation4], 4294967040 }
  0x7b   :  { %250 = vsyncpa [#allocation3], 1 }
  0x7c   :  { %251 = vsyncpa [#allocation4], 1 }

</bundles_post_ra>
